<compile_context>
chip_gen: v6e
topology: v6e:2x2x1
jax: 0.10.0
libtpu: 0.0.40
codegen_flags: <defaults>
</compile_context>

<pallas_src>
import jax
import jax.numpy as jnp
from jax.experimental import pallas as pl
from jax.experimental.pallas import tpu as pltpu


def _angular_kernel(x_ref, w1_ref, w2_ref, o_ref):
    # x_ref : (B_blk, c_in, t)   spatial tile(s); channels on sublanes, spatial on lanes
    # w1_ref: (ac, c_in)         conv1 weight (full, VMEM-resident)
    # w2_ref: (c_out, ac)        conv2 weight (full, VMEM-resident)
    # o_ref : (B_blk, c_out, t)
    w1 = w1_ref[...]
    w2 = w2_ref[...]
    # B_blk is a small static int (1 on the big-spatial path, <=16 on the
    # batch-folded small-spatial path) -> static unroll of plain 2D dots.
    for i in range(x_ref.shape[0]):
        h = jnp.dot(w1, x_ref[i], preferred_element_type=jnp.float32)
        h = jnp.maximum(h, 0.2 * h)                       # LeakyReLU(0.2)
        y = jnp.dot(w2, h, preferred_element_type=jnp.float32)
        y = jnp.maximum(y, 0.2 * y)                       # LeakyReLU(0.2)
        o_ref[i] = y.astype(o_ref.dtype)


def _pick_batch_fold(b, hw, t_hw, cap=16):
    """Largest divisor of b (capped) whose folded block stays within ~t_hw lanes."""
    target = max(1, min(cap, t_hw // max(hw, 1)))
    cands = [d for d in range(1, b + 1) if b % d == 0 and d <= target]
    bblk = max(cands)
    # v7x megacore: prefer >= 2 grid steps if each step still carries >= 1024 lanes.
    if b // bblk < 2:
        smaller = [d for d in cands if b // d >= 2 and d * hw >= 1024]
        if smaller:
            bblk = max(smaller)
    return bblk


def angular_conv_pallas(fm, w1, w2, *, t_hw=32768, out_dtype=None):
    """fm: (b, c, n, h, w).  w1: (AC, c*n), w2: (AC*n, AC).

    Returns (b, AC, n, h, w) matching PyTorch AngularConv.forward.
    """
    b, c, n, h, w = fm.shape
    c_in = c * n
    ac = w1.shape[0]
    c_out = w2.shape[0]
    assert w1.shape == (ac, c_in)
    assert w2.shape == (c_out, ac)
    assert c_out % n == 0

    out_dtype = fm.dtype if out_dtype is None else jnp.dtype(out_dtype)
    hw = h * w
    # fm.view(b, c*n, 1, h, w): channel index = c_i * n + n_i (row-major reshape).
    # Collapsing (c, n) and (h, w) is a pure view: no data movement.
    x = fm.reshape(b, c_in, hw)

    if hw <= t_hw:
        # Small spatial extent: whole spatial dim in one block (always layout-
        # legal), fold several batch elements per grid step to amortize the
        # fixed per-step pipeline overhead.
        t = hw
        bblk = _pick_batch_fold(b, hw, t_hw)
        grid = (b // bblk, 1)
    else:
        # Large spatial extent: big lane-dense tiles; the ragged last block is
        # handled by Pallas (garbage lanes are computed but dropped on store,
        # which is safe because there is no cross-lane reduction).  No XLA-side
        # pad of the input and no slice of the 4x larger output.
        assert t_hw % 128 == 0
        t = t_hw
        bblk = 1
        grid = (b, pl.cdiv(hw, t))

    flops = 2 * b * hw * (c_in * ac + ac * c_out)
    bytes_accessed = (
        b * c_in * hw * x.dtype.itemsize
        + w1.size * w1.dtype.itemsize
        + w2.size * w2.dtype.itemsize
        + b * c_out * hw * out_dtype.itemsize
    )

    out_flat = pl.pallas_call(
        _angular_kernel,
        out_shape=jax.ShapeDtypeStruct((b, c_out, hw), out_dtype),
        grid_spec=pltpu.PrefetchScalarGridSpec(
            num_scalar_prefetch=0,
            grid=grid,
            in_specs=[
                pl.BlockSpec((bblk, c_in, t), lambda bi, si: (bi, 0, si)),
                pl.BlockSpec((ac, c_in), lambda bi, si: (0, 0)),    # W1 (whole)
                pl.BlockSpec((c_out, ac), lambda bi, si: (0, 0)),   # W2 (whole)
            ],
            out_specs=pl.BlockSpec((bblk, c_out, t), lambda bi, si: (bi, 0, si)),
        ),
        compiler_params=pltpu.CompilerParams(
            dimension_semantics=("parallel", "parallel"),
            # ~11.5 MiB of double-buffered blocks + f32 intermediates at t=32768;
            # 48 MiB clears v5e's 16 MiB default scoped limit and stays under
            # v7x's 64 MiB physical VMEM with headroom.
            vmem_limit_bytes=48 * 1024 * 1024,
        ),
        cost_estimate=pl.CostEstimate(
            flops=flops, transcendentals=0, bytes_accessed=bytes_accessed),
    )(x, w1, w2)

    # out.view(b, -1, n, h, w): split C_out = AC * n (AC outer, n inner) — a
    # pure contiguous reshape, no transpose needed in this layout.
    return out_flat.reshape(b, ac, n, h, w)


def _reference(fm, w1, w2):
    """Pure-JAX reference mirroring the PyTorch ops."""
    b, c, n, h, w = fm.shape
    a_in = fm.reshape(b, c * n, h, w)                       # depth dim of 1 squeezed
    h1 = jnp.einsum("oc,bchw->bohw", w1, a_in)
    h1 = jnp.where(h1 >= 0, h1, 0.2 * h1)
    h2 = jnp.einsum("oc,bchw->bohw", w2, h1)
    h2 = jnp.where(h2 >= 0, h2, 0.2 * h2)
    return h2.reshape(b, -1, n, h, w)


if __name__ == "__main__":
    # Small, consistent shapes: ch=2, angRes=2 -> n = angRes^2 = 4, AngChannel=8
    ch, angRes, AngChannel = 2, 2, 8
    b = 2
    n = angRes * angRes
    c_in = ch * n                      # Conv3d #1 in_channels = ch*angRes*angRes
    c_out = AngChannel * n             # Conv3d #2 out_channels

    key = jax.random.PRNGKey(0)
    k_fm, k_fm2, k_w1, k_w2 = jax.random.split(key, 4)

    # Deterministic kaiming-uniform-ish init (Conv3d default), 1x1x1 kernel dropped.
    bound1 = 1.0 / (c_in ** 0.5)
    bound2 = 1.0 / (AngChannel ** 0.5)
    w1 = jax.random.uniform(k_w1, (AngChannel, c_in), jnp.float32, -bound1, bound1)
    w2 = jax.random.uniform(k_w2, (c_out, AngChannel), jnp.float32, -bound2, bound2)

    # --- Test 1: small spatial extent -> batch-folded single-block path. ---
    hh, ww = 16, 16
    fm = jax.random.normal(k_fm, (b, ch, n, hh, ww), dtype=jnp.float32)
    out = jax.block_until_ready(angular_conv_pallas(fm, w1, w2))
    ref = _reference(fm, w1, w2)
    assert out.shape == (b, AngChannel, n, hh, ww), out.shape
    assert jnp.allclose(out, ref, atol=1e-5, rtol=1e-5)

    # --- Test 2: tiled path with a ragged (non-multiple-of-tile) spatial size,
    #     no pad / slice round-trips (tile forced small to exercise the path). ---
    hh2, ww2 = 16, 17                  # hw = 272, tile = 128 -> ragged last block
    fm2 = jax.random.normal(k_fm2, (b, ch, n, hh2, ww2), dtype=jnp.float32)
    out2 = jax.block_until_ready(angular_conv_pallas(fm2, w1, w2, t_hw=128))
    ref2 = _reference(fm2, w1, w2)
    assert out2.shape == (b, AngChannel, n, hh2, ww2), out2.shape
    assert jnp.allclose(out2, ref2, atol=1e-5, rtol=1e-5)

    print("KERNEL_OK")
</pallas_src>

<mosaic_0001>
module attributes {stable_mosaic.version = 11 : i64} {
  func.func @_angular_kernel(%arg0: i32, %arg1: i32, %arg2: memref<2x8x256xf32, #tpu.memory_space<vmem>>, %arg3: memref<8x8xf32, #tpu.memory_space<vmem>>, %arg4: memref<32x8xf32, #tpu.memory_space<vmem>>, %arg5: memref<2x32x256xf32, #tpu.memory_space<vmem>>) attributes {dimension_semantics = [#tpu.dimension_semantics<parallel>, #tpu.dimension_semantics<parallel>], iteration_bounds = array<i64: 1, 1>, scalar_prefetch = 0 : i64, scratch_operands = 0 : i64, tpu.core_type = #tpu.core_type<tc>, window_params = [{transform_indices = @transform_0, window_bounds = array<i64: 2, 8, 256>}, {pipeline_mode = #tpu.pipeline_mode<synchronous>, transform_indices = @transform_1, window_bounds = array<i64: 8, 8>}, {pipeline_mode = #tpu.pipeline_mode<synchronous>, transform_indices = @transform_2, window_bounds = array<i64: 32, 8>}, {transform_indices = @transform_3, window_bounds = array<i64: 2, 32, 256>}]} {
    %c0 = arith.constant 0 : index
    %c0_0 = arith.constant 0 : index
    %0 = vector.load %arg3[%c0, %c0_0] : memref<8x8xf32, #tpu.memory_space<vmem>>, vector<8x8xf32>
    %c0_1 = arith.constant 0 : index
    %c0_2 = arith.constant 0 : index
    %1 = vector.load %arg4[%c0_1, %c0_2] : memref<32x8xf32, #tpu.memory_space<vmem>>, vector<32x8xf32>
    %c0_3 = arith.constant 0 : index
    %c0_4 = arith.constant 0 : index
    %c0_5 = arith.constant 0 : index
    %2 = vector.load %arg2[%c0_3, %c0_4, %c0_5] : memref<2x8x256xf32, #tpu.memory_space<vmem>>, vector<1x8x256xf32>
    %3 = vector.shape_cast %2 : vector<1x8x256xf32> to vector<8x256xf32>
    %cst = arith.constant dense<0.000000e+00> : vector<8x256xf32>
    %4 = tpu.matmul %0, %3, %cst {dimension_numbers = #tpu.dot_dimension_numbers<[1], [0], [0], [1], [0, 0, 1, 1], [], []>} : vector<8x8xf32>, vector<8x256xf32>, vector<8x256xf32> -> vector<8x256xf32>
    %cst_6 = arith.constant 2.000000e-01 : f32
    %5 = vector.broadcast %cst_6 : f32 to vector<8x256xf32>
    %6 = arith.mulf %5, %4 : vector<8x256xf32>
    %7 = arith.maximumf %4, %6 : vector<8x256xf32>
    %cst_7 = arith.constant dense<0.000000e+00> : vector<32x256xf32>
    %8 = tpu.matmul %1, %7, %cst_7 {dimension_numbers = #tpu.dot_dimension_numbers<[1], [0], [0], [1], [0, 0, 1, 1], [], []>} : vector<32x8xf32>, vector<8x256xf32>, vector<32x256xf32> -> vector<32x256xf32>
    %cst_8 = arith.constant 2.000000e-01 : f32
    %9 = vector.broadcast %cst_8 : f32 to vector<32x256xf32>
    %10 = arith.mulf %9, %8 : vector<32x256xf32>
    %11 = arith.maximumf %8, %10 : vector<32x256xf32>
    %c0_9 = arith.constant 0 : index
    %c0_10 = arith.constant 0 : index
    %c0_11 = arith.constant 0 : index
    %12 = vector.load %arg5[%c0_9, %c0_10, %c0_11] : memref<2x32x256xf32, #tpu.memory_space<vmem>>, vector<1x32x256xf32>
    %13 = vector.shape_cast %12 : vector<1x32x256xf32> to vector<32x256xf32>
    %14 = vector.shape_cast %11 : vector<32x256xf32> to vector<1x32x256xf32>
    tpu.vector_store %arg5[%c0_9, %c0_10, %c0_11], %14 {strides = array<i32>} : memref<2x32x256xf32, #tpu.memory_space<vmem>>, vector<1x32x256xf32>,
    %c1 = arith.constant 1 : index
    %c0_12 = arith.constant 0 : index
    %c0_13 = arith.constant 0 : index
    %15 = vector.load %arg2[%c1, %c0_12, %c0_13] : memref<2x8x256xf32, #tpu.memory_space<vmem>>, vector<1x8x256xf32>
    %16 = vector.shape_cast %15 : vector<1x8x256xf32> to vector<8x256xf32>
    %cst_14 = arith.constant dense<0.000000e+00> : vector<8x256xf32>
    %17 = tpu.matmul %0, %16, %cst_14 {dimension_numbers = #tpu.dot_dimension_numbers<[1], [0], [0], [1], [0, 0, 1, 1], [], []>} : vector<8x8xf32>, vector<8x256xf32>, vector<8x256xf32> -> vector<8x256xf32>
    %cst_15 = arith.constant 2.000000e-01 : f32
    %18 = vector.broadcast %cst_15 : f32 to vector<8x256xf32>
    %19 = arith.mulf %18, %17 : vector<8x256xf32>
    %20 = arith.maximumf %17, %19 : vector<8x256xf32>
    %cst_16 = arith.constant dense<0.000000e+00> : vector<32x256xf32>
    %21 = tpu.matmul %1, %20, %cst_16 {dimension_numbers = #tpu.dot_dimension_numbers<[1], [0], [0], [1], [0, 0, 1, 1], [], []>} : vector<32x8xf32>, vector<8x256xf32>, vector<32x256xf32> -> vector<32x256xf32>
    %cst_17 = arith.constant 2.000000e-01 : f32
    %22 = vector.broadcast %cst_17 : f32 to vector<32x256xf32>
    %23 = arith.mulf %22, %21 : vector<32x256xf32>
    %24 = arith.maximumf %21, %23 : vector<32x256xf32>
    %c1_18 = arith.constant 1 : index
    %c0_19 = arith.constant 0 : index
    %c0_20 = arith.constant 0 : index
    %25 = vector.load %arg5[%c1_18, %c0_19, %c0_20] : memref<2x32x256xf32, #tpu.memory_space<vmem>>, vector<1x32x256xf32>
    %26 = vector.shape_cast %25 : vector<1x32x256xf32> to vector<32x256xf32>
    %27 = vector.shape_cast %24 : vector<32x256xf32> to vector<1x32x256xf32>
    tpu.vector_store %arg5[%c1_18, %c0_19, %c0_20], %27 {strides = array<i32>} : memref<2x32x256xf32, #tpu.memory_space<vmem>>, vector<1x32x256xf32>,
    return
  }
  func.func @transform_0(%arg0: i32, %arg1: i32) -> (i32, i32, i32) {
    %c0_i32 = arith.constant 0 : i32
    %c0_i32_0 = arith.constant 0 : i32
    return %arg0, %c0_i32, %arg1 : i32, i32, i32
  }
  func.func @transform_1(%arg0: i32, %arg1: i32) -> (i32, i32) {
    %c0_i32 = arith.constant 0 : i32
    %c0_i32_0 = arith.constant 0 : i32
    %c0_i32_1 = arith.constant 0 : i32
    return %c0_i32, %c0_i32_0 : i32, i32
  }
  func.func @transform_2(%arg0: i32, %arg1: i32) -> (i32, i32) {
    %c0_i32 = arith.constant 0 : i32
    %c0_i32_0 = arith.constant 0 : i32
    %c0_i32_1 = arith.constant 0 : i32
    return %c0_i32, %c0_i32_0 : i32, i32
  }
  func.func @transform_3(%arg0: i32, %arg1: i32) -> (i32, i32, i32) {
    %c0_i32 = arith.constant 0 : i32
    %c0_i32_0 = arith.constant 0 : i32
    return %arg0, %c0_i32, %arg1 : i32, i32, i32
  }
}

</mosaic_0001>

<bundles_post_ra>
// kernel: tpu_custom_call.1
= control target key start
LH: loop header
LB: loop body
LE: loop exit
PB: predicated region body
PF: predicated region fallthrough
CT: control target
= control target key end

     0   :  { %vm22_vm0 = vcmask 64512   ;;  %s536_s0 = inlined_call_operand.vmem [shape: f32[2,8,256], index: 0, kind: input, shape index: {}]   ;;  %s537_s1 = inlined_call_operand.vmem [shape: f32[8,8], index: 1, kind: input, shape index: {}]   ;;  %s538_s2 = inlined_call_operand.vmem [shape: f32[32,8], index: 2, kind: input, shape index: {}]   ;;  %s539_s3 = inlined_call_operand.hbm [shape: f32[2,32,256], index: 3, kind: output, shape index: {}]  }
   0x1   :  { %v21_v0 = vld [vmem:[%s536_s0 + $0x8] sm:$0xff]  ;;  %v440_v1 = vld [vmem:[%s536_s0 + $0x18] sm:$0xff]  ;;  %v20_v2 = vld [vmem:[%s536_s0] sm:$0xff] }
   0x2   :  { %56 = vmatprep.subr.mxu1 %v21_v0  ;;  %259 = vmatprep.subr.mxu0 %v440_v1  ;;  %v439_v3 = vld [vmem:[%s536_s0 + $0x10] sm:$0xff]  ;;  %v15_v4 = vld [vmem:[%s537_s1] sm:$0xff] }
   0x3   :  { %8 = vsyncpa [#allocation3], 0  ;;  %57 = vmatpush1.msra.mxu1 %v20_v2  ;;  %v472_v5 = vmov 0.0   ;;  %260 = vmatpush1.msra.mxu0 %v439_v3  ;;  %v16_v18 = vld [vmem:[%s538_s2] sm:$0xff]  ;;  %v17_v19 = vld [vmem:[%s538_s2 + $0x8] sm:$0xff] }
   0x4   :  { %90 = vmatprep.mubr.f32.mxu1 %v472_v5  ;;  %293 = vmatprep.mubr.f32.mxu0 %v472_v5  ;;  %v18_v20 = vld [vmem:[%s538_s2 + $0x10] sm:$0xff]  ;;  %v19_v21 = vld [vmem:[%s538_s2 + $0x18] sm:$0xff]  ;;  %s473_s2 = smov [#allocation2]  }
   0x5   :  { %434 = vmatmul.mubr.msk.f32.vlgmr.msra.gmra.mxu1 %vm22_vm0, %v15_v4  ;;  %441 = vmatmul.mubr.msk.f32.vlgmr.msra.gmra.mxu0 %vm22_vm0, %v15_v4  ;;  %s423_s28 = sshll.u32 %s473_s2, 4  ;;  %s424_s28 = int_to_ptr.vmem [resolvable:$true] %s423_s28 }
   0x6   :  { %177 = vmatprep.mubr.f32.mxu1 %v472_v5  ;;  %368 = vmatprep.mubr.f32.mxu0 %v472_v5  ;;  %s450_s29 = scalar_lea.vmem %s424_s28, 2048  ;;  %p455_p1 = scmp.lt.s32.totalorder %s424_s28, %s424_s28 }
   0x7   :  { %p451_p0 = scmp.ne.s32.totalorder %s424_s28, %s450_s29  ;;  %p456_p2 = scmp.lt.s32.totalorder %s450_s29, %s450_s29 }
   0x9   :  { %p457_p3 = por %p456_p2, %p455_p1 }
   0xb   :  { %p458_p4 = pnand %p457_p3, %p451_p0 }
  0xc5   :  { %v92_v6 = vpop.f32.mrf.mxu1  ;;  %v295_v7 = vpop.f32.mrf.mxu0 }
  0xc6   :  { %v97_v8 = vmul.f32 0.2, %v92_v6  ;;  %v300_v9 = vmul.f32 0.2, %v295_v7 }
  0xc7   :  { %v94_v10 = vpop.f32.mrf.mxu1  ;;  %v297_v11 = vpop.f32.mrf.mxu0 }
  0xc8   :  { %v98_v12 = vmul.f32 0.2, %v94_v10  ;;  %v301_v13 = vmul.f32 0.2, %v297_v11  ;;  %v99_v16 = vmax.f32 %v92_v6, %v97_v8  ;;  %v302_v17 = vmax.f32 %v295_v7, %v300_v9 }
  0xca   :  { %v100_v14 = vmax.f32 %v94_v10, %v98_v12  ;;  %v303_v15 = vmax.f32 %v297_v11, %v301_v13 }
  0xcc   :  { %143 = vmatprep.subr.mxu1 %v100_v14  ;;  %334 = vmatprep.subr.mxu0 %v303_v15 }
  0xcd   :  { %144 = vmatpush1.msra.mxu1 %v99_v16  ;;  %335 = vmatpush1.msra.mxu0 %v302_v17 }
  0xce   :  { %435 = vmatmul.mubr.msk.f32.vlgmr.msra.gmra.mxu1 %vm22_vm0, %v16_v18  ;;  %442 = vmatmul.mubr.msk.f32.vlgmr.msra.gmra.mxu0 %vm22_vm0, %v16_v18 }
  0xcf   :  { %183 = vmatprep.mubr.f32.mxu1 %v472_v5  ;;  %374 = vmatprep.mubr.f32.mxu0 %v472_v5 }
  0xd2   :  { %436 = vmatmul.mubr.msk.f32.gmra.mxu1 %vm22_vm0, %v17_v19  ;;  %443 = vmatmul.mubr.msk.f32.gmra.mxu0 %vm22_vm0, %v17_v19 }
  0xd3   :  { %189 = vmatprep.mubr.f32.mxu1 %v472_v5  ;;  %380 = vmatprep.mubr.f32.mxu0 %v472_v5 }
  0xd6   :  { %437 = vmatmul.mubr.msk.f32.gmra.mxu1 %vm22_vm0, %v18_v20  ;;  %444 = vmatmul.mubr.msk.f32.gmra.mxu0 %vm22_vm0, %v18_v20 }
  0xd7   :  { %195 = vmatprep.mubr.f32.mxu1 %v472_v5  ;;  %386 = vmatprep.mubr.f32.mxu0 %v472_v5 }
  0xda   :  { %438 = vmatmul.mubr.msk.f32.gmra.mxu1 %vm22_vm0, %v19_v21  ;;  %445 = vmatmul.mubr.msk.f32.gmra.mxu0 %vm22_vm0, %v19_v21 }
 0x18e   :  { %v179_v22 = vpop.f32.mrf.mxu1  ;;  %v370_v23 = vpop.f32.mrf.mxu0 }
 0x18f   :  { %v202_v24 = vmul.f32 0.2, %v179_v22  ;;  %v393_v25 = vmul.f32 0.2, %v370_v23 }
 0x190   :  { %v181_v26 = vpop.f32.mrf.mxu1  ;;  %v372_v27 = vpop.f32.mrf.mxu0 }
 0x191   :  { %v210_v28 = vmax.f32 %v179_v22, %v202_v24  ;;  %v401_v29 = vmax.f32 %v370_v23, %v393_v25  ;;  %v203_v30 = vmul.f32 0.2, %v181_v26  ;;  %v394_v31 = vmul.f32 0.2, %v372_v27 }
 0x192   :  { %v185_v32 = vpop.f32.mrf.mxu1  ;;  %v376_v33 = vpop.f32.mrf.mxu0 }
 0x193   :  { %218 = vst [vmem:[#allocation2] sm:$0xff] %v210_v28  ;;  %410 = vst [vmem:[#allocation2 + $0x40] sm:$0xff] %v401_v29  ;;  %v211_v34 = vmax.f32 %v181_v26, %v203_v30  ;;  %v402_v35 = vmax.f32 %v372_v27, %v394_v31  ;;  %v204_v36 = vmul.f32 0.2, %v185_v32  ;;  %v395_v37 = vmul.f32 0.2, %v376_v33 }
 0x194   :  { %v187_v38 = vpop.f32.mrf.mxu1  ;;  %v378_v39 = vpop.f32.mrf.mxu0 }
 0x195   :  { %219 = vst [vmem:[#allocation2 + $0x8] sm:$0xff] %v211_v34  ;;  %411 = vst [vmem:[#allocation2 + $0x48] sm:$0xff] %v402_v35  ;;  %v212_v40 = vmax.f32 %v185_v32, %v204_v36  ;;  %v403_v41 = vmax.f32 %v376_v33, %v395_v37  ;;  %v205_v42 = vmul.f32 0.2, %v187_v38  ;;  %v396_v43 = vmul.f32 0.2, %v378_v39 }
 0x196   :  { %v191_v44 = vpop.f32.mrf.mxu1  ;;  %v382_v45 = vpop.f32.mrf.mxu0 }
 0x197   :  { %220 = vst [vmem:[#allocation2 + $0x10] sm:$0xff] %v212_v40  ;;  %412 = vst [vmem:[#allocation2 + $0x50] sm:$0xff] %v403_v41  ;;  %v213_v46 = vmax.f32 %v187_v38, %v205_v42  ;;  %v404_v47 = vmax.f32 %v378_v39, %v396_v43  ;;  %v206_v48 = vmul.f32 0.2, %v191_v44  ;;  %v397_v49 = vmul.f32 0.2, %v382_v45 }
 0x198   :  { %v193_v50 = vpop.f32.mrf.mxu1  ;;  %v384_v51 = vpop.f32.mrf.mxu0 }
 0x199   :  { %221 = vst [vmem:[#allocation2 + $0x18] sm:$0xff] %v213_v46  ;;  %413 = vst [vmem:[#allocation2 + $0x58] sm:$0xff] %v404_v47  ;;  %v214_v52 = vmax.f32 %v191_v44, %v206_v48  ;;  %v405_v53 = vmax.f32 %v382_v45, %v397_v49  ;;  %v207_v54 = vmul.f32 0.2, %v193_v50  ;;  %v398_v55 = vmul.f32 0.2, %v384_v51 }
 0x19a   :  { %v197_v56 = vpop.f32.mrf.mxu1  ;;  %v388_v57 = vpop.f32.mrf.mxu0 }
 0x19b   :  { %222 = vst [vmem:[#allocation2 + $0x20] sm:$0xff] %v214_v52  ;;  %414 = vst [vmem:[#allocation2 + $0x60] sm:$0xff] %v405_v53  ;;  %v215_v58 = vmax.f32 %v193_v50, %v207_v54  ;;  %v406_v59 = vmax.f32 %v384_v51, %v398_v55  ;;  %v208_v60 = vmul.f32 0.2, %v197_v56  ;;  %v399_v61 = vmul.f32 0.2, %v388_v57 }
 0x19c   :  { %v199_v62 = vpop.f32.mrf.mxu1  ;;  %v390_v63 = vpop.f32.mrf.mxu0 }
 0x19d   :  { %223 = vst [vmem:[#allocation2 + $0x28] sm:$0xff] %v215_v58  ;;  %415 = vst [vmem:[#allocation2 + $0x68] sm:$0xff] %v406_v59  ;;  %v216_v0 = vmax.f32 %v197_v56, %v208_v60  ;;  %v407_v1 = vmax.f32 %v388_v57, %v399_v61  ;;  %v209_v2 = vmul.f32 0.2, %v199_v62  ;;  %v400_v3 = vmul.f32 0.2, %v390_v63 }
 0x19f   :  { %224 = vst [vmem:[#allocation2 + $0x30] sm:$0xff] %v216_v0  ;;  %416 = vst [vmem:[#allocation2 + $0x70] sm:$0xff] %v407_v1  ;;  %v217_v4 = vmax.f32 %v199_v62, %v209_v2  ;;  %v408_v5 = vmax.f32 %v390_v63, %v400_v3 }
 0x1a1   :  { %225 = vst [vmem:[#allocation2 + $0x38] sm:$0xff] %v217_v4  ;;  %417 = vst [vmem:[#allocation2 + $0x78] sm:$0xff] %v408_v5 }
 0x1a2   :  { %461 = shalt.err (!%p458_p4)
}
 0x1a3   :  { %s474_s30 = smov 256   ;;  %s475_s4 = smov 16  }
 0x1a4   :  { %429 = dma.vmem_to_hbm [thread:$0]  %s424_s28, 2048, %s539_s3, [#allocation3], %s474_s30, %s474_s30, %s475_s4  }
 0x1a5   :  { %470 = dma.done.wait [#allocation3], 2048  }
 0x1a6   :  { %471 = vsyncadd [#allocation3], 4294965248 }
 0x1a7   :  { %433 = vsyncpa [#allocation3], 1 }

</bundles_post_ra>
